<compile_context>
chip_gen: v5e
topology: v5e:2x2
jax: 0.10.0
libtpu: 0.0.40
codegen_flags: <defaults>
</compile_context>

<pallas_src>
import functools

import numpy as np
import jax
import jax.numpy as jnp
from jax.experimental import pallas as pl
from jax.experimental.pallas import tpu as pltpu

_LANE = 128
_MAX_TILE_M = 16384  # hard cap on rows per grid step (8 MiB per f32 slab)


def _sublane_multiple(dtype) -> int:
    # f32 -> 8, bf16/f16 -> 16, int8/fp8 -> 32 (sub-32-bit packs along sublanes)
    itemsize = np.dtype(dtype).itemsize
    return max(8, 32 // max(1, itemsize))


def _round_up(x, m):
    return ((x + m - 1) // m) * m


def _vmem_budget_bytes() -> int:
    """Per-generation budget for double-buffered I/O tiles + f32 temporaries."""
    try:
        kind = jax.devices()[0].device_kind.lower()
    except Exception:
        kind = ""
    if "v5 lite" in kind or "v5e" in kind or "v5lite" in kind:
        return 12 << 20   # small scoped VMEM on v5e; big tiles buy nothing at 0.8 TB/s
    if "v6" in kind or "trillium" in kind:
        return 48 << 20   # 128 MiB physical -> large tiles amortize step overhead
    return 32 << 20       # v7x (64 MiB physical) and unknown: stay conservative


def _layout(numel, slab_dtypes):
    """Slab row count m, rows per grid step, and an explicit VMEM limit."""
    sub = max(_sublane_multiple(dt) for dt in slab_dtypes)
    m = pl.cdiv(numel, _LANE)
    # VMEM bytes per slab-row: double-buffered I/O blocks plus a rough
    # allowance for in-kernel f32 temporaries (diff, iota, masked diff).
    io_row_bytes = sum(2 * _LANE * np.dtype(dt).itemsize for dt in slab_dtypes)
    tmp_row_bytes = 4 * _LANE * 4
    row_bytes = io_row_bytes + tmp_row_bytes
    if m <= sub:
        tile_m = m  # single full block (block row dim == full array dim is legal)
    else:
        tile_m = min(_vmem_budget_bytes() // row_bytes, _MAX_TILE_M)
        # Keep >= 2 grid steps so double-buffering / megacore have work to split.
        tile_m = min(tile_m, _round_up(pl.cdiv(m, 2), sub))
        tile_m = max(sub, (tile_m // sub) * sub)
    vmem_limit = int(max(tile_m * row_bytes + (8 << 20), 16 << 20))
    return m, tile_m, vmem_limit


def _to_slab(x, m):
    """View x as an (m, 128) slab; pads only when numel % 128 != 0."""
    flat = x.reshape(-1)  # free for contiguous inputs
    total = m * _LANE
    if flat.shape[0] != total:
        # TODO(synk): this <=127-element pad still costs one HBM copy.
        flat = jnp.pad(flat, (0, total - flat.shape[0]))
    return flat.reshape(m, _LANE)


# ---------------------------------------------------------------------------
# Sum-reduction kernels: each grid step writes an (8, 128)-aligned partial.
# ---------------------------------------------------------------------------
def _partial_rows(tile_m):
    return 8 if tile_m % 8 == 0 else 1


def _tile_partial_sum(d, tile_m):
    if tile_m % 8 == 0:
        # Leading-dim-only reshape (layout no-op) + sum over the major axis:
        # pure VALU vreg adds, no cross-lane XLU work inside the hot loop.
        return jnp.sum(d.reshape(tile_m // 8, 8, _LANE), axis=0)   # (8, 128)
    return jnp.sum(d, axis=0, keepdims=True)                        # (1, 128)


def _masked_rewrite(out_ref, d, m_valid, tile_m):
    i = pl.program_id(0)

    # Only the last block can stick out past the slab; its out-of-range rows
    # hold undefined data, so re-reduce with them masked to zero.
    @pl.when((i + 1) * tile_m > m_valid)
    def _():
        rows = jax.lax.broadcasted_iota(jnp.int32, (tile_m, _LANE), 0) + i * tile_m
        dm = jnp.where(rows < m_valid, d, 0.0)
        out_ref[...] = _tile_partial_sum(dm, tile_m)[None]


def _l1_sum_kernel(pred_ref, tgt_ref, out_ref, *, m_valid, tile_m):
    d = jnp.abs(pred_ref[...].astype(jnp.float32)
                - tgt_ref[...].astype(jnp.float32))
    out_ref[...] = _tile_partial_sum(d, tile_m)[None]
    _masked_rewrite(out_ref, d, m_valid, tile_m)


def _l1_sum_weighted_kernel(pred_ref, tgt_ref, w_ref, out_ref, *, m_valid, tile_m):
    d = jnp.abs(pred_ref[...].astype(jnp.float32)
                - tgt_ref[...].astype(jnp.float32))
    d = d * w_ref[...].astype(jnp.float32)
    out_ref[...] = _tile_partial_sum(d, tile_m)[None]
    _masked_rewrite(out_ref, d, m_valid, tile_m)


# ---------------------------------------------------------------------------
# Elementwise kernels (reduction == "none"); loss_weight fused in-kernel.
# Out-of-range rows of the last block are dropped by Pallas boundary writes.
# ---------------------------------------------------------------------------
def _l1_elem_kernel(pred_ref, tgt_ref, out_ref, *, loss_weight):
    d = jnp.abs(pred_ref[...].astype(jnp.float32)
                - tgt_ref[...].astype(jnp.float32))
    out_ref[...] = (loss_weight * d).astype(out_ref.dtype)


def _l1_elem_weighted_kernel(pred_ref, tgt_ref, w_ref, out_ref, *, loss_weight):
    d = jnp.abs(pred_ref[...].astype(jnp.float32)
                - tgt_ref[...].astype(jnp.float32))
    d = d * w_ref[...].astype(jnp.float32)
    out_ref[...] = (loss_weight * d).astype(out_ref.dtype)


# ---------------------------------------------------------------------------
# pallas_call wrappers.
# ---------------------------------------------------------------------------
def _sum_l1(pred2d, tgt2d, w2d, tile_m, vmem_limit):
    m, n = pred2d.shape
    num_tiles = pl.cdiv(m, tile_m)
    prow = _partial_rows(tile_m)
    spec = pl.BlockSpec((tile_m, n), lambda i: (i, 0))
    out_spec = pl.BlockSpec((1, prow, n), lambda i: (i, 0, 0))
    if w2d is None:
        kernel = functools.partial(_l1_sum_kernel, m_valid=m, tile_m=tile_m)
        args, in_specs = (pred2d, tgt2d), [spec, spec]
    else:
        kernel = functools.partial(_l1_sum_weighted_kernel, m_valid=m, tile_m=tile_m)
        args, in_specs = (pred2d, tgt2d, w2d), [spec, spec, spec]
    partials = pl.pallas_call(
        kernel,
        out_shape=jax.ShapeDtypeStruct((num_tiles, prow, n), jnp.float32),
        grid_spec=pltpu.PrefetchScalarGridSpec(
            num_scalar_prefetch=0,
            grid=(num_tiles,),
            in_specs=in_specs,
            out_specs=out_spec,
        ),
        compiler_params=pltpu.CompilerParams(
            dimension_semantics=("parallel",),
            vmem_limit_bytes=vmem_limit),
    )(*args)
    return jnp.sum(partials)  # tiny (num_tiles, prow, 128) finish


def _elem_l1(pred2d, tgt2d, w2d, tile_m, vmem_limit, loss_weight, out_dtype):
    m, n = pred2d.shape
    num_tiles = pl.cdiv(m, tile_m)
    spec = pl.BlockSpec((tile_m, n), lambda i: (i, 0))
    if w2d is None:
        kernel = functools.partial(_l1_elem_kernel, loss_weight=loss_weight)
        args, in_specs = (pred2d, tgt2d), [spec, spec]
    else:
        kernel = functools.partial(_l1_elem_weighted_kernel, loss_weight=loss_weight)
        args, in_specs = (pred2d, tgt2d, w2d), [spec, spec, spec]
    return pl.pallas_call(
        kernel,
        out_shape=jax.ShapeDtypeStruct((m, n), out_dtype),
        grid_spec=pltpu.PrefetchScalarGridSpec(
            num_scalar_prefetch=0,
            grid=(num_tiles,),
            in_specs=in_specs,
            out_specs=spec,
        ),
        compiler_params=pltpu.CompilerParams(
            dimension_semantics=("parallel",),
            vmem_limit_bytes=vmem_limit),
    )(*args)


class L1Loss:
    """JAX/Pallas port of the PyTorch L1Loss module (forward pass only)."""

    def __init__(self, reduction="mean", loss_weight=1.0):
        assert reduction in ("none", "mean", "sum")
        self.reduction = reduction
        self.loss_weight = float(loss_weight)

    def __call__(self, pred, target, weight=None, avg_factor=None,
                 reduction_override=None):
        assert reduction_override in (None, "none", "mean", "sum")
        reduction = reduction_override if reduction_override else self.reduction

        orig_shape = pred.shape
        numel = max(1, int(np.prod(orig_shape)))

        slab_dtypes = [pred.dtype, target.dtype]
        if weight is not None:
            weight = jnp.broadcast_to(weight, orig_shape)  # no-op when same shape
            slab_dtypes.append(weight.dtype)
        if reduction == "none":
            slab_dtypes.append(pred.dtype)  # output slab also lives in VMEM

        m, tile_m, vmem_limit = _layout(numel, slab_dtypes)
        pred2d = _to_slab(pred, m)
        tgt2d = _to_slab(target, m)
        w2d = _to_slab(weight, m) if weight is not None else None

        if reduction == "none":
            out2d = _elem_l1(pred2d, tgt2d, w2d, tile_m, vmem_limit,
                             self.loss_weight, pred.dtype)
            if numel == m * _LANE:
                return out2d.reshape(orig_shape)  # free reshape, no copy
            # TODO(synk): lane-ragged sizes pay one extra slice copy here.
            return out2d.reshape(-1)[:numel].reshape(orig_shape)

        total = _sum_l1(pred2d, tgt2d, w2d, tile_m, vmem_limit)
        if reduction == "mean":
            if avg_factor is not None:
                total = total / jnp.asarray(avg_factor, jnp.float32)
            else:
                total = total / jnp.float32(numel)
        # reduction == "sum": mmdet semantics ignore avg_factor for 'sum'.
        return (self.loss_weight * total).astype(jnp.float32)


# ---------------------------------------------------------------------------
# Reference (plain JAX) for verification.
# ---------------------------------------------------------------------------
def _ref_l1(pred, target, weight, reduction, avg_factor, loss_weight):
    loss = jnp.abs(pred.astype(jnp.float32) - target.astype(jnp.float32))
    if weight is not None:
        loss = loss * weight.astype(jnp.float32)
    if reduction == "none":
        return (loss_weight * loss).astype(pred.dtype)
    total = jnp.sum(loss)
    if reduction == "sum":
        return loss_weight * total
    if avg_factor is not None:
        return loss_weight * total / avg_factor
    return loss_weight * total / loss.size


if __name__ == "__main__":
    key = jax.random.PRNGKey(0)
    k1, k2, k3, k4, k5 = jax.random.split(key, 5)

    ok = True

    # bbox-regression-like shape (lane-ragged: 2*100*7 = 1400 elements).
    pred = jax.random.normal(k1, (2, 100, 7), dtype=jnp.float32)
    target = jax.random.normal(k2, (2, 100, 7), dtype=jnp.float32)
    weight = jax.random.uniform(k3, (2, 100, 7), dtype=jnp.float32)

    loss_mod = L1Loss(reduction="mean", loss_weight=2.0)

    # mean, unweighted
    out = jax.block_until_ready(loss_mod(pred, target))
    ref = _ref_l1(pred, target, None, "mean", None, 2.0)
    ok &= bool(jnp.allclose(out, ref, rtol=1e-5, atol=1e-5))

    # mean with weight + avg_factor
    out = jax.block_until_ready(loss_mod(pred, target, weight=weight,
                                         avg_factor=123.0))
    ref = _ref_l1(pred, target, weight, "mean", 123.0, 2.0)
    ok &= bool(jnp.allclose(out, ref, rtol=1e-5, atol=1e-5))

    # sum reduction override (weighted)
    out = jax.block_until_ready(loss_mod(pred, target, weight=weight,
                                         reduction_override="sum"))
    ref = _ref_l1(pred, target, weight, "sum", None, 2.0)
    ok &= bool(jnp.allclose(out, ref, rtol=1e-4, atol=1e-4))

    # none reduction (weighted and unweighted)
    out = jax.block_until_ready(loss_mod(pred, target, weight=weight,
                                         reduction_override="none"))
    ref = _ref_l1(pred, target, weight, "none", None, 2.0)
    ok &= bool(jnp.allclose(out, ref, rtol=1e-5, atol=1e-5))
    ok &= out.shape == pred.shape

    out = jax.block_until_ready(loss_mod(pred, target, reduction_override="none"))
    ref = _ref_l1(pred, target, None, "none", None, 2.0)
    ok &= bool(jnp.allclose(out, ref, rtol=1e-5, atol=1e-5))

    # lane-aligned shape (3*8*128 = 3072 elements, no pad, partial last block).
    pred2 = jax.random.normal(k4, (3, 8, 128), dtype=jnp.float32)
    target2 = jax.random.normal(k5, (3, 8, 128), dtype=jnp.float32)
    out = jax.block_until_ready(loss_mod(pred2, target2))
    ref = _ref_l1(pred2, target2, None, "mean", None, 2.0)
    ok &= bool(jnp.allclose(out, ref, rtol=1e-5, atol=1e-5))

    out = jax.block_until_ready(loss_mod(pred2, target2, reduction_override="none"))
    ref = _ref_l1(pred2, target2, None, "none", None, 2.0)
    ok &= bool(jnp.allclose(out, ref, rtol=1e-5, atol=1e-5))
    ok &= out.shape == pred2.shape

    if ok:
        print("KERNEL_OK")
    else:
        print("MISMATCH")
</pallas_src>

<mosaic_0001>
module attributes {stable_mosaic.version = 11 : i64} {
  func.func @_l1_sum_kernel(%arg0: i32, %arg1: memref<8x128xf32, #tpu.memory_space<vmem>>, %arg2: memref<8x128xf32, #tpu.memory_space<vmem>>, %arg3: memref<1x8x128xf32, #tpu.memory_space<vmem>>) attributes {dimension_semantics = [#tpu.dimension_semantics<parallel>], iteration_bounds = array<i64: 2>, scalar_prefetch = 0 : i64, scratch_operands = 0 : i64, tpu.core_type = #tpu.core_type<tc>, window_params = [{transform_indices = @transform_0, window_bounds = array<i64: 8, 128>}, {transform_indices = @transform_1, window_bounds = array<i64: 8, 128>}, {transform_indices = @transform_2, window_bounds = array<i64: 1, 8, 128>}]} {
    %c0 = arith.constant 0 : index
    %c0_0 = arith.constant 0 : index
    %0 = vector.load %arg1[%c0, %c0_0] : memref<8x128xf32, #tpu.memory_space<vmem>>, vector<8x128xf32>
    %c0_1 = arith.constant 0 : index
    %c0_2 = arith.constant 0 : index
    %1 = vector.load %arg2[%c0_1, %c0_2] : memref<8x128xf32, #tpu.memory_space<vmem>>, vector<8x128xf32>
    %2 = arith.subf %0, %1 : vector<8x128xf32>
    %3 = math.absf %2 : vector<8x128xf32>
    %4 = vector.shape_cast %3 : vector<8x128xf32> to vector<1x8x128xf32>
    %cst = arith.constant dense<0.000000e+00> : vector<8x128xf32>
    %5 = vector.multi_reduction <add>, %4, %cst [0] : vector<1x8x128xf32> to vector<8x128xf32>
    %6 = vector.shape_cast %5 : vector<8x128xf32> to vector<1x8x128xf32>
    %c0_3 = arith.constant 0 : index
    %c0_4 = arith.constant 0 : index
    %c0_5 = arith.constant 0 : index
    %7 = vector.load %arg3[%c0_3, %c0_4, %c0_5] : memref<1x8x128xf32, #tpu.memory_space<vmem>>, vector<1x8x128xf32>
    tpu.vector_store %arg3[%c0_3, %c0_4, %c0_5], %6 {strides = array<i32>} : memref<1x8x128xf32, #tpu.memory_space<vmem>>, vector<1x8x128xf32>,
    %c1_i32 = arith.constant 1 : i32
    %8 = arith.addi %arg0, %c1_i32 : i32
    %c8_i32 = arith.constant 8 : i32
    %9 = arith.muli %8, %c8_i32 : i32
    %c11_i32 = arith.constant 11 : i32
    %10 = arith.cmpi sgt, %9, %c11_i32 : i32
    %11 = arith.extui %10 : i1 to i32
    %c0_i32 = arith.constant 0 : i32
    %12 = arith.cmpi ne, %11, %c0_i32 : i32
    scf.if %12 {
      %13 = tpu.iota {dimensions = array<i32: 0>} : vector<8x128xi32>
      %c8_i32_6 = arith.constant 8 : i32
      %14 = arith.muli %arg0, %c8_i32_6 : i32
      %15 = vector.broadcast %14 : i32 to vector<8x128xi32>
      %16 = arith.addi %13, %15 : vector<8x128xi32>
      %c11_i32_7 = arith.constant 11 : i32
      %17 = vector.broadcast %c11_i32_7 : i32 to vector<8x128xi32>
      %18 = arith.cmpi slt, %16, %17 : vector<8x128xi32>
      %cst_8 = arith.constant 0.000000e+00 : f32
      %19 = vector.broadcast %cst_8 : f32 to vector<8x128xf32>
      %20 = arith.select %18, %3, %19 : vector<8x128xi1>, vector<8x128xf32>
      %21 = vector.shape_cast %20 : vector<8x128xf32> to vector<1x8x128xf32>
      %cst_9 = arith.constant dense<0.000000e+00> : vector<8x128xf32>
      %22 = vector.multi_reduction <add>, %21, %cst_9 [0] : vector<1x8x128xf32> to vector<8x128xf32>
      %23 = vector.shape_cast %22 : vector<8x128xf32> to vector<1x8x128xf32>
      %c0_10 = arith.constant 0 : index
      %c0_11 = arith.constant 0 : index
      %c0_12 = arith.constant 0 : index
      %24 = vector.load %arg3[%c0_10, %c0_11, %c0_12] : memref<1x8x128xf32, #tpu.memory_space<vmem>>, vector<1x8x128xf32>
      tpu.vector_store %arg3[%c0_10, %c0_11, %c0_12], %23 {strides = array<i32>} : memref<1x8x128xf32, #tpu.memory_space<vmem>>, vector<1x8x128xf32>,
    } else {
    }
    return
  }
  func.func @transform_0(%arg0: i32) -> (i32, i32) {
    %c0_i32 = arith.constant 0 : i32
    %c0_i32_0 = arith.constant 0 : i32
    return %arg0, %c0_i32 : i32, i32
  }
  func.func @transform_1(%arg0: i32) -> (i32, i32) {
    %c0_i32 = arith.constant 0 : i32
    %c0_i32_0 = arith.constant 0 : i32
    return %arg0, %c0_i32 : i32, i32
  }
  func.func @transform_2(%arg0: i32) -> (i32, i32, i32) {
    %c0_i32 = arith.constant 0 : i32
    %c0_i32_0 = arith.constant 0 : i32
    %c0_i32_1 = arith.constant 0 : i32
    return %arg0, %c0_i32, %c0_i32_0 : i32, i32, i32
  }
}

</mosaic_0001>

<bundles_post_ra>
// kernel: tpu_custom_call.1
= control target key start
LH: loop header
LB: loop body
LE: loop exit
PB: predicated region body
PF: predicated region fallthrough
CT: control target
= control target key end

     0   :  { %7 = vsyncpa [#allocation3], 0  ;;  %s708_s0 = inlined_call_operand.hbm [shape: f32[11,128], index: 0, kind: input, shape index: {}]   ;;  %s709_s1 = inlined_call_operand.hbm [shape: f32[11,128], index: 1, kind: input, shape index: {}]   ;;  %s710_s2 = inlined_call_operand.hbm [shape: f32[2,8,128], index: 2, kind: output, shape index: {}]  }
   0x1   :  { %9 = vsyncpa [#allocation3 + $0x1], 0 }
   0x2   :  { %10 = vsyncpa [#allocation6], 0 }
   0x3   :  { %12 = vsyncpa [#allocation6 + $0x1], 0 }
   0x4   :  { %13 = vsyncpa [#allocation4], 0 }
   0x5   :  { %15 = vsyncpa [#allocation4 + $0x1], 0  ;;  %s548_s9 = smov 0   ;;  %s550_s10 = smov 0  }
   0x6   :  { %s552_s11 = smov 0   ;;  %s554_s12 = smov 0  }
   0x7 LB: > { %s569_s13 = sadd.s32 4294967295, %s531_s12   ;;  %s330_s14 = sadd.s32 4294967294, %s531_s12   ;;  %s531_s12 = sphi %s554_s12, %s721_s12   ;;  %s527_s11 = sphi %s552_s11, %s720_s11   ;;  %s523_s10 = sphi %s550_s10, %s719_s10   ;;  %s519_s9 = sphi %s548_s9, %s718_s9  }
   0x8   : > { %s573_s15 = sadd.s32 1, %s531_s12   ;;  %s28_s16 = sadd.s32 1, %s527_s11 }
   0x9   : > { %s25_s17 = ssub.s32 %s531_s12, %s573_s15  ;;  %p35_p0 = scmp.ne.s32.totalorder %s527_s11, %s523_s10 }
   0xa   : > { %p26_p1 = scmp.eq.s32.totalorder %s25_s17, 0  ;;  %p36_p2 = scmp.eq.s32.totalorder %s531_s12, 0 }
   0xb   : > { %p41_p3 = scmp.ne.s32.totalorder %s523_s10, %s519_s9  ;;  %p42_p4 = scmp.eq.s32.totalorder %s569_s13, 0 }
   0xc   : > { %s585_s18 = scalar_select %p26_p1, %s527_s11, %s28_s16  }
   0xd   : > { %p587_p5 = por %p36_p2, %p35_p0  ;;  %p591_p6 = por %p42_p4, %p41_p3 }
   0xe   : > { %p91_p7 = scmp.eq.s32.totalorder %s569_s13, 1  ;;  %p97_p8 = scmp.eq.s32.totalorder %s330_s14, 1 }
   0xf   : > { %p367_p10 = scmp.lt.s32.totalorder %s531_s12, 2  ;;  %s607_s23 = sand.u32 1, %s527_s11  }
  0x10   : > { %p598_p11 = por %p91_p7, %p35_p0  ;;  %p602_p12 = por %p97_p8, %p41_p3 }
  0x11   : > { %s334_s24 = sshll.u32 %s531_s12, 3  ;;  %s333_s25 = sshll.u32 %s607_s23, 3 }
  0x12   : > { %s125_s28 = scalar_lea.hbm %s708_s0, %s334_s24  ;;  %s121_s30 = scalar_lea.vmem [#allocation2], %s333_s25 }
  0x13   : > { %s127_s29 = sshll.u32 %s125_s28, 4  ;;  %s129_s3 = sshll.u32 %s121_s30, 4  ;;  %s128_s29 = int_to_ptr.hbm [resolvable:$true] %s127_s29  ;;  %s130_s3 = int_to_ptr.vmem [resolvable:$true] %s129_s3 }
  0x14   : > { %p616_p13 = pnand %p367_p10, %p587_p5  ;;  %p337_p0 = scmp.ge.s32.totalorder %s531_s12, 1 }
  0x15   : > { %p153_p1 = scmp.lt.s32.totalorder %s531_s12, 3  ;;  %s118_s5 = scalar_lea.sflag [#allocation3], %s607_s23 }
  0x16   : > { %s401_s6 = sshra.s32 %s128_s29, 4  ;;  %p405_p3 = pneg %p616_p13  ;;  %s402_s6 = int_to_ptr.hbm [resolvable:$true] %s401_s6 }
  0x17   : > { %s403_s7 = scalar_lea.hbm %s402_s6, 8  ;;  %s408_s16 = scalar_lea.hbm %s708_s0, 16 }
  0x18   : > { %p404_p2 = scmp.ne.s32.totalorder %s402_s6, %s403_s7  ;;  %p409_p5 = scmp.lt.s32.totalorder %s402_s6, %s708_s0 }
  0x19   : > { %p410_p8 = scmp.lt.s32.totalorder %s408_s16, %s403_s7 }
  0x1a   : > { %p406_p4 = pnand %p405_p3, %p404_p2 }
  0x1b   : > { %p411_p10 = por %p410_p8, %p409_p5 }
  0x1c   : > { %p407_p7 = pneg %p406_p4 }
  0x1e   : > { %p412_p9 = pnand %p411_p10, %p407_p7 }
  0x20   : > { %415 = shalt.err (!%p412_p9)
}
  0x21   : > { %359 = dma.hbm_to_vmem [thread:$0]  (!%p616_p13), %s128_s29, 128, %s130_s3, %s118_s5  }
  0x22   : > { %p640_p2 = pnand %p337_p0, %p153_p1  ;;  %s144_s30 = scalar_lea.hbm %s709_s1, %s334_s24 }
  0x23   : > { %s146_s6 = sshll.u32 %s144_s30, 4  ;;  %s140_s7 = scalar_lea.vmem [#allocation5], %s333_s25  ;;  %s147_s6 = int_to_ptr.hbm [resolvable:$true] %s146_s6 }
  0x24   : > { %s148_s8 = sshll.u32 %s140_s7, 4  ;;  %s137_s14 = scalar_lea.sflag [#allocation6], %s607_s23  ;;  %s149_s8 = int_to_ptr.vmem [resolvable:$true] %s148_s8 }
  0x25   : > { %s431_s16 = sshra.s32 %s147_s6, 4  ;;  %s438_s5 = scalar_lea.hbm %s709_s1, 16  ;;  %s432_s16 = int_to_ptr.hbm [resolvable:$true] %s431_s16 }
  0x26   : > { %s433_s17 = scalar_lea.hbm %s432_s16, 8  ;;  %p439_p4 = scmp.lt.s32.totalorder %s432_s16, %s709_s1 }
  0x27   : > { %p434_p9 = scmp.ne.s32.totalorder %s432_s16, %s433_s17  ;;  %p440_p7 = scmp.lt.s32.totalorder %s438_s5, %s433_s17 }
  0x29   : > { %p436_p0 = pnand %p434_p9, %p405_p3  ;;  %p441_p5 = por %p440_p7, %p439_p4 }
  0x2b   : > { %p437_p1 = pneg %p436_p0 }
  0x2d   : > { %p442_p8 = pnand %p441_p5, %p437_p1 }
  0x2f   : > { %445 = shalt.err (!%p442_p8)
}
  0x30   : > { %362 = dma.hbm_to_vmem [thread:$0]  (!%p616_p13), %s147_s6, 128, %s149_s8, %s137_s14  }
  0x31   : > { %157 = sbr.rel (%p640_p2) target bundleno = 89 (0x59), region = 28  ;;  %s662_s23 = sand.u32 (!%p640_p2), 1, %s523_s10  }
  0x32   : > { %s338_s25 = sshll.u32 (!%p640_p2), %s662_s23, 3  ;;  %s160_s27 = scalar_lea.sflag (!%p640_p2), [#allocation3], %s662_s23 }
  0x33   : > { %s163_s28 = scalar_lea.vmem (!%p640_p2), [#allocation2], %s338_s25 }
  0x36   : > { %506 = dma.done.wait (%p591_p6), %s160_s27, 128  }
  0x37   : > { %508 = vsyncadd (%p591_p6), %s160_s27, 4294967168  ;;  %s170_s4 = scalar_lea.sflag [#allocation6], %s662_s23  ;;  %s173_s30 = scalar_lea.vmem [#allocation5], %s338_s25 }
  0x38   : > { %510 = dma.done.wait (%p591_p6), %s170_s4, 128  }
  0x39   : > { %512 = vsyncadd (%p591_p6), %s170_s4, 4294967168  ;;  %s348_s26 = sshll.u32 %s569_s13, 3  ;;  %v200_v0 = vld [vmem:[%s163_s28] sm:$0xff]  ;;  %v201_v1 = vld [vmem:[%s173_s30] sm:$0xff]  ;;  %s199_s7 = scalar_lea.vmem [#allocation7], %s338_s25 }
  0x3a   : > { %s349_s6 = sadd.s32 8, %s348_s26  ;;  %v202_v2 = vsub.f32 %v200_v0, %v201_v1 }
  0x3b   : > { %p342_p13 = scmp.le.s32.totalorder %s349_s6, 11 }
  0x3c   : > { %v203_v3 = vand.u32 2147483647, %v202_v2 }
  0x3d   : > { %211 = sbr.rel (%p342_p13) target bundleno = 75 (0x4b), region = 40 }
  0x3e   : > { %205 = vst [vmem:[%s199_s7] sm:$0xff] %v203_v3 }
  0x42   : > { %v212_v4 = vlaneseq  ;;  %v215_v5 = vstv %s348_s26 }
  0x44   : > { %v213_v6 = vshrl.u32 %v212_v4, 7 }
  0x46   : > { %v216_v7 = vadd.s32 %v215_v5, %v213_v6 }
  0x48   : > { %vm217_vm0 = vcmp.lt.s32.totalorder %v216_v7, 11 }
  0x49   : > { %v218_v8 = vsel %vm217_vm0, %v203_v3, 0.0 }
  0x4a   : > { %220 = vst [vmem:[%s199_s7] sm:$0xff] %v218_v8 }
  0x4b PF: > { %s232_s13 = scalar_lea.hbm %s710_s2, %s348_s26  ;;  %s234_s14 = sshll.u32 %s199_s7, 4  ;;  %s235_s14 = int_to_ptr.vmem [resolvable:$true] %s234_s14 }
  0x4c   : > { %s236_s16 = sshll.u32 %s232_s13, 4  ;;  %s222_s17 = scalar_lea.sflag [#allocation4], %s662_s23  ;;  %s237_s16 = int_to_ptr.hbm [resolvable:$true] %s236_s16 }
  0x4d   : > { %s475_s29 = sshra.s32 %s237_s16, 4  ;;  %s481_s24 = scalar_lea.hbm %s710_s2, 16  ;;  %s476_s29 = int_to_ptr.hbm [resolvable:$true] %s475_s29 }
  0x4e   : > { %s477_s3 = scalar_lea.hbm %s476_s29, 8  ;;  %p482_p2 = scmp.lt.s32.totalorder %s476_s29, %s710_s2 }
  0x4f   : > { %p478_p6 = scmp.ne.s32.totalorder %s476_s29, %s477_s3  ;;  %p483_p9 = scmp.lt.s32.totalorder %s481_s24, %s477_s3 }
  0x51   : > { %p479_p3 = pnand %p478_p6, %p598_p11  ;;  %p484_p0 = por %p483_p9, %p482_p2 }
  0x53   : > { %p480_p10 = pneg %p479_p3 }
  0x55   : > { %p485_p1 = pnand %p484_p0, %p480_p10 }
  0x57   : > { %488 = shalt.err (!%p485_p1)
}
  0x58   : > { %354 = dma.vmem_to_hbm [thread:$0]  (%p598_p11), %s235_s14, 128, %s237_s16, %s222_s17  }
  0x59 PF: > { %s248_s23 = sand.u32 1, %s519_s9   ;;  %p717_p4 = scmp.ge.s32.totalorder %s531_s12, 2 }
  0x5a   : > { %s249_s28 = scalar_lea.sflag [#allocation4], %s248_s23 }
  0x5b   : > { %p364_p7 = pnand %p717_p4, %p602_p12 }
  0x5d   : > { %p365_p5 = pneg %p364_p7 }
  0x5f   : > { %514 = dma.done.wait (%p365_p5), %s249_s28, 128  }
  0x60   : > { %516 = vsyncadd (%p365_p5), %s249_s28, 4294967168  ;;  %p18_p8 = scmp.ge.s32.totalorder %s573_s15, 4   ;;  %s718_s9 = smov %s523_s10 }
  0x61   : > { %s719_s10 = smov %s527_s11  ;;  %s720_s11 = smov %s585_s18 }
  0x62   : > { %s721_s12 = smov %s573_s15  ;;  %20 = sbr.rel (!%p18_p8) target bundleno = 7 (0x7), region = 90 }
  0x67   :  { %255 = vsyncpa [#allocation3], 1 }
  0x68   :  { %257 = vsyncpa [#allocation3 + $0x1], 1 }
  0x69   :  { %258 = vsyncpa [#allocation6], 1 }
  0x6a   :  { %260 = vsyncpa [#allocation6 + $0x1], 1 }
  0x6b   :  { %261 = vsyncpa [#allocation4], 1 }
  0x6c   :  { %263 = vsyncpa [#allocation4 + $0x1], 1 }

</bundles_post_ra>
